<compile_context>
chip_gen: v6e
topology: v6e:2x2x1
jax: 0.10.0
libtpu: 0.0.40
codegen_flags: <defaults>
</compile_context>

<pallas_src>
import functools

import numpy as np

import jax
import jax.numpy as jnp
from jax.experimental import pallas as pl
from jax.experimental.pallas import tpu as pltpu


# ----------------------------- Pallas kernel ------------------------------ #
def _fused_cnn_kernel(x_ref, mask_ref, w1_ref, w2_ref, y1_ref, y2_ref, *, wp):
    """conv1 -> ReLU -> conv2 (3x3, stride 1, pad 1), batch folded into lanes.

    x_ref   : (Cin_p, PT)   zero-padded input; per batch the (H+2, W+2) grid
                            is flattened row-major and padded to P (multiple
                            of 128); PT = N*P.
    mask_ref: (1, PT)       1.0 on interior (real output) positions, else 0.
    w1_ref  : (Cmid_p, 9*Cin_p + 8)  tap-major flattened conv1 weights; the
                            trailing 8 columns carry the bias in column 0
                            (rest zero) and pair with the all-ones block.
    w2_ref  : (Cout_p, 9*Cmid_p + 8) same layout for conv2.
    y1_ref  : (Cmid_p, PT)  conv1 output (pre-ReLU), ring/tail zeroed.
    y2_ref  : (Cout_p, PT)  conv2 output (pre-ReLU), ring/tail garbage (sliced
                            away by the wrapper).
    """
    x = x_ref[...]                      # (Cin_p, PT)
    mask = mask_ref[...]                # (1, PT)
    pt = x.shape[-1]
    ones = jnp.ones((8, pt), dtype=x.dtype)   # bias rows (weight col 0 = bias)

    def conv3x3(inp, w_flat):
        # K-stacked conv: 9 lane-rolled copies of `inp` (tap t = di*3 + dj,
        # shift = (di-1)*wp + (dj-1) flat positions) plus the all-ones bias
        # block, concatenated along sublanes, then ONE MXU dot with f32
        # accumulation.  Roll wrap-around only ever lands in the padding ring
        # / lane tail of some batch segment, never in interior outputs.
        blocks = []
        for t in range(9):
            di, dj = t // 3, t % 3
            off = (di - 1) * wp + (dj - 1)
            blocks.append(inp if off == 0
                          else pltpu.roll(inp, shift=(-off) % pt, axis=1))
        blocks.append(ones)
        stacked = jnp.concatenate(blocks, axis=0)          # (9*C + 8, PT)
        # NOTE: at non-toy channel counts cast w_flat/stacked to bf16 here
        # (keep the f32 accumulator and f32 stored features) for the
        # full-rate MXU path on all generations.
        return jnp.dot(w_flat, stacked, preferred_element_type=jnp.float32)

    # hook "conv1": pre-ReLU conv1 output.  The single mask multiply zeroes
    # the padding ring / lane tail so ReLU(pre1) is a valid zero-padded input
    # for conv2.
    pre1 = conv3x3(x, w1_ref[...]) * mask
    y1_ref[...] = pre1.astype(y1_ref.dtype)

    h = jnp.maximum(pre1, 0.0)                             # ReLU, stays in VMEM

    # hook "conv2": pre-ReLU conv2 output.  No second mask (dead work): the
    # wrapper slices away the ring and lane tail.
    pre2 = conv3x3(h, w2_ref[...])
    y2_ref[...] = pre2.astype(y2_ref.dtype)


# ------------------------------ JAX wrapper -------------------------------- #
def _round_up(v, m):
    return ((v + m - 1) // m) * m


def _flatten_conv_weights(w, b, cin_p, cout_p):
    """(Cout, Cin, 3, 3) + (Cout,) -> (Cout_p, 9*Cin_p + 8).

    Tap-major columns (col = t*Cin_p + c); the trailing 8 columns carry the
    bias in column 0 (rest zero) to pair with the kernel's all-ones block.
    """
    cout, cin = w.shape[0], w.shape[1]
    w_t = jnp.transpose(w, (2, 3, 0, 1)).reshape(9, cout, cin)
    w_t = jnp.pad(w_t, ((0, 0), (0, cout_p - cout), (0, cin_p - cin)))
    w_flat = jnp.transpose(w_t, (1, 0, 2)).reshape(cout_p, 9 * cin_p)
    b_block = jnp.zeros((cout_p, 8), w.dtype).at[:cout, 0].set(b)
    return jnp.concatenate([w_flat, b_block], axis=1)


def fused_feature_convs(x_nchw, w1, b1, w2, b2):
    """Runs conv1 -> ReLU -> conv2 in a single Pallas call (single grid step).

    Returns (conv1_out, conv2_out), both NCHW float32 pre-activation tensors,
    i.e. exactly what the PyTorch forward hooks capture.
    """
    n, cin, h, w = x_nchw.shape
    cmid, cout = w1.shape[0], w2.shape[0]
    hp, wp = h + 2, w + 2                  # spatially zero-padded extent
    p_valid = hp * wp                      # logical flattened padded spatial
    p = _round_up(p_valid, 128)            # lane-dense per-batch segment
    pt = n * p                             # batch folded into lanes
    cin_p = _round_up(cin, 8)
    cmid_p = _round_up(cmid, 8)
    cout_p = _round_up(cout, 8)

    # Zero-pad spatially (NCHW), flatten HW row-major, pad lanes + channels,
    # and fold the batch into the lane axis: (Cin_p, N*P).
    xp = jnp.pad(x_nchw, ((0, 0), (0, 0), (1, 1), (1, 1)))
    xp = xp.reshape(n, cin, p_valid)
    xp = jnp.pad(xp, ((0, 0), (0, cin_p - cin), (0, p - p_valid)))
    xp = jnp.transpose(xp, (1, 0, 2)).reshape(cin_p, pt)

    w1_flat = _flatten_conv_weights(w1, b1, cin_p, cmid_p)   # (Cmid_p, 9*Cin_p+8)
    w2_flat = _flatten_conv_weights(w2, b2, cmid_p, cout_p)  # (Cout_p, 9*Cmid_p+8)

    # Interior mask (trace-time constant), tiled once per batch segment.
    m2d = np.zeros((hp, wp), np.float32)
    m2d[1:1 + h, 1:1 + w] = 1.0
    m1 = np.pad(m2d.reshape(1, p_valid), ((0, 0), (0, p - p_valid)))
    mask = jnp.asarray(np.tile(m1, (1, n)))                  # (1, PT)

    kernel = functools.partial(_fused_cnn_kernel, wp=wp)

    vmem_spec = pl.BlockSpec(memory_space=pltpu.MemorySpace.VMEM)
    # Single invocation (no grid): at these shapes per-step overhead would
    # dominate, so megacore/grid splitting is intentionally not used.
    # TODO(synk): at real channel counts / image sizes, add a halo'd P-axis
    # tile (grid over lanes via pl.ds in the index_map) and set
    # vmem_limit_bytes so this layout fits v7x's 64 MiB VMEM.
    y1p, y2p = pl.pallas_call(
        kernel,
        out_shape=(
            jax.ShapeDtypeStruct((cmid_p, pt), jnp.float32),
            jax.ShapeDtypeStruct((cout_p, pt), jnp.float32),
        ),
        in_specs=[vmem_spec, vmem_spec, vmem_spec, vmem_spec],
        out_specs=(vmem_spec, vmem_spec),
    )(xp, mask, w1_flat, w2_flat)

    def to_nchw(y_flat, c):
        # Lane-dense flat output -> NCHW by dropping the lane tail, padding
        # ring and channel padding.
        y = y_flat.reshape(-1, n, p)[:c, :, :p_valid]
        y = y.reshape(c, n, hp, wp)[:, :, 1:1 + h, 1:1 + w]
        return jnp.transpose(y, (1, 0, 2, 3))

    return to_nchw(y1p, cmid), to_nchw(y2p, cout)


# ------------------- FeatureExtractor-equivalent forward ------------------- #
def init_params(cin=4, cmid=8, cout=8, kh=3, kw=3):
    """Deterministic synthetic parameters (no checkpoint loading)."""
    k = jax.random.PRNGKey(42)
    k1, k2, k3, k4 = jax.random.split(k, 4)
    s1 = (cin * kh * kw) ** -0.5
    s2 = (cmid * kh * kw) ** -0.5
    return {
        "conv1_w": jax.random.uniform(k1, (cmid, cin, kh, kw), jnp.float32,
                                      -s1, s1),
        "conv1_b": jax.random.uniform(k2, (cmid,), jnp.float32, -s1, s1),
        "conv2_w": jax.random.uniform(k3, (cout, cmid, kh, kw), jnp.float32,
                                      -s2, s2),
        "conv2_b": jax.random.uniform(k4, (cout,), jnp.float32, -s2, s2),
    }


@functools.partial(jax.jit, static_argnames=("layers",))
def feature_extractor_forward(x, params, layers=("conv1", "conv2")):
    """Mirrors FeatureExtractor.forward: run the model, return hooked outputs."""
    pre1, pre2 = fused_feature_convs(
        x, params["conv1_w"], params["conv1_b"],
        params["conv2_w"], params["conv2_b"])
    features = {"conv1": pre1, "conv2": pre2}
    return {layer: features[layer] for layer in layers}


if __name__ == "__main__":
    # Small shapes consistent with the module: batch=2, channels=4, spatial=16.
    key = jax.random.PRNGKey(0)
    x = jax.random.normal(key, (2, 4, 16, 16), dtype=jnp.float32)  # NCHW
    params = init_params()

    feats = feature_extractor_forward(x, params)
    feats = jax.block_until_ready(feats)

    assert feats["conv1"].shape == (2, 8, 16, 16)
    assert feats["conv2"].shape == (2, 8, 16, 16)

    # Pure-JAX reference of the wrapped model + hook semantics.
    def conv_ref(z, wgt, bias):
        y = jax.lax.conv_general_dilated(
            z, wgt, window_strides=(1, 1), padding="SAME",
            dimension_numbers=("NCHW", "OIHW", "NCHW"),
            precision=jax.lax.Precision.HIGHEST)
        return y + bias.reshape(1, -1, 1, 1)

    ref1 = conv_ref(x, params["conv1_w"], params["conv1_b"])
    ref2 = conv_ref(jnp.maximum(ref1, 0.0), params["conv2_w"], params["conv2_b"])

    assert jnp.all(jnp.isfinite(feats["conv1"]))
    assert jnp.all(jnp.isfinite(feats["conv2"]))
    assert jnp.allclose(feats["conv1"], ref1, atol=5e-2, rtol=5e-2)
    assert jnp.allclose(feats["conv2"], ref2, atol=5e-2, rtol=5e-2)
    print("KERNEL_OK")
</pallas_src>

<mosaic_0001>
module attributes {stable_mosaic.version = 11 : i64} {
  func.func @_fused_cnn_kernel(%arg0: memref<8x768xf32, #tpu.memory_space<vmem>>, %arg1: memref<1x768xf32, #tpu.memory_space<vmem>>, %arg2: memref<8x80xf32, #tpu.memory_space<vmem>>, %arg3: memref<8x80xf32, #tpu.memory_space<vmem>>, %arg4: memref<8x768xf32, #tpu.memory_space<vmem>>, %arg5: memref<8x768xf32, #tpu.memory_space<vmem>>) attributes {dimension_semantics = [], scalar_prefetch = 0 : i64, scratch_operands = 0 : i64, tpu.core_type = #tpu.core_type<tc>} {
    %c0 = arith.constant 0 : index
    %c0_0 = arith.constant 0 : index
    %0 = vector.load %arg0[%c0, %c0_0] : memref<8x768xf32, #tpu.memory_space<vmem>>, vector<8x768xf32>
    %c0_1 = arith.constant 0 : index
    %c0_2 = arith.constant 0 : index
    %1 = vector.load %arg1[%c0_1, %c0_2] : memref<1x768xf32, #tpu.memory_space<vmem>>, vector<1x768xf32>
    %cst = arith.constant 1.000000e+00 : f32
    %2 = vector.broadcast %cst : f32 to vector<8x768xf32>
    %c0_3 = arith.constant 0 : index
    %c0_4 = arith.constant 0 : index
    %3 = vector.load %arg2[%c0_3, %c0_4] : memref<8x80xf32, #tpu.memory_space<vmem>>, vector<8x80xf32>
    %c19_i32 = arith.constant 19 : i32
    %4 = tpu.dynamic_rotate %0 by %c19_i32 dim 1 : vector<8x768xf32>, i32 -> vector<8x768xf32>
    %c18_i32 = arith.constant 18 : i32
    %5 = tpu.dynamic_rotate %0 by %c18_i32 dim 1 : vector<8x768xf32>, i32 -> vector<8x768xf32>
    %c17_i32 = arith.constant 17 : i32
    %6 = tpu.dynamic_rotate %0 by %c17_i32 dim 1 : vector<8x768xf32>, i32 -> vector<8x768xf32>
    %c1_i32 = arith.constant 1 : i32
    %7 = tpu.dynamic_rotate %0 by %c1_i32 dim 1 : vector<8x768xf32>, i32 -> vector<8x768xf32>
    %c767_i32 = arith.constant 767 : i32
    %8 = tpu.dynamic_rotate %0 by %c767_i32 dim 1 : vector<8x768xf32>, i32 -> vector<8x768xf32>
    %c751_i32 = arith.constant 751 : i32
    %9 = tpu.dynamic_rotate %0 by %c751_i32 dim 1 : vector<8x768xf32>, i32 -> vector<8x768xf32>
    %c750_i32 = arith.constant 750 : i32
    %10 = tpu.dynamic_rotate %0 by %c750_i32 dim 1 : vector<8x768xf32>, i32 -> vector<8x768xf32>
    %c749_i32 = arith.constant 749 : i32
    %11 = tpu.dynamic_rotate %0 by %c749_i32 dim 1 : vector<8x768xf32>, i32 -> vector<8x768xf32>
    %12 = tpu.concatenate %4, %5, %6, %7, %0, %8, %9, %10, %11, %2 in 0 : vector<8x768xf32>, vector<8x768xf32>, vector<8x768xf32>, vector<8x768xf32>, vector<8x768xf32>, vector<8x768xf32>, vector<8x768xf32>, vector<8x768xf32>, vector<8x768xf32>, vector<8x768xf32> -> vector<80x768xf32>
    %cst_5 = arith.constant dense<0.000000e+00> : vector<8x768xf32>
    %13 = tpu.matmul %3, %12, %cst_5 {dimension_numbers = #tpu.dot_dimension_numbers<[1], [0], [0], [1], [0, 0, 1, 1], [], []>} : vector<8x80xf32>, vector<80x768xf32>, vector<8x768xf32> -> vector<8x768xf32>
    %14 = vector.broadcast %1 : vector<1x768xf32> to vector<8x768xf32>
    %15 = arith.mulf %13, %14 : vector<8x768xf32>
    %c0_6 = arith.constant 0 : index
    %c0_7 = arith.constant 0 : index
    %16 = vector.load %arg4[%c0_6, %c0_7] : memref<8x768xf32, #tpu.memory_space<vmem>>, vector<8x768xf32>
    tpu.vector_store %arg4[%c0_6, %c0_7], %15 {strides = array<i32>} : memref<8x768xf32, #tpu.memory_space<vmem>>, vector<8x768xf32>,
    %cst_8 = arith.constant 0.000000e+00 : f32
    %17 = vector.broadcast %cst_8 : f32 to vector<8x768xf32>
    %18 = arith.maximumf %15, %17 : vector<8x768xf32>
    %c0_9 = arith.constant 0 : index
    %c0_10 = arith.constant 0 : index
    %19 = vector.load %arg3[%c0_9, %c0_10] : memref<8x80xf32, #tpu.memory_space<vmem>>, vector<8x80xf32>
    %c19_i32_11 = arith.constant 19 : i32
    %20 = tpu.dynamic_rotate %18 by %c19_i32_11 dim 1 : vector<8x768xf32>, i32 -> vector<8x768xf32>
    %c18_i32_12 = arith.constant 18 : i32
    %21 = tpu.dynamic_rotate %18 by %c18_i32_12 dim 1 : vector<8x768xf32>, i32 -> vector<8x768xf32>
    %c17_i32_13 = arith.constant 17 : i32
    %22 = tpu.dynamic_rotate %18 by %c17_i32_13 dim 1 : vector<8x768xf32>, i32 -> vector<8x768xf32>
    %c1_i32_14 = arith.constant 1 : i32
    %23 = tpu.dynamic_rotate %18 by %c1_i32_14 dim 1 : vector<8x768xf32>, i32 -> vector<8x768xf32>
    %c767_i32_15 = arith.constant 767 : i32
    %24 = tpu.dynamic_rotate %18 by %c767_i32_15 dim 1 : vector<8x768xf32>, i32 -> vector<8x768xf32>
    %c751_i32_16 = arith.constant 751 : i32
    %25 = tpu.dynamic_rotate %18 by %c751_i32_16 dim 1 : vector<8x768xf32>, i32 -> vector<8x768xf32>
    %c750_i32_17 = arith.constant 750 : i32
    %26 = tpu.dynamic_rotate %18 by %c750_i32_17 dim 1 : vector<8x768xf32>, i32 -> vector<8x768xf32>
    %c749_i32_18 = arith.constant 749 : i32
    %27 = tpu.dynamic_rotate %18 by %c749_i32_18 dim 1 : vector<8x768xf32>, i32 -> vector<8x768xf32>
    %28 = tpu.concatenate %20, %21, %22, %23, %18, %24, %25, %26, %27, %2 in 0 : vector<8x768xf32>, vector<8x768xf32>, vector<8x768xf32>, vector<8x768xf32>, vector<8x768xf32>, vector<8x768xf32>, vector<8x768xf32>, vector<8x768xf32>, vector<8x768xf32>, vector<8x768xf32> -> vector<80x768xf32>
    %cst_19 = arith.constant dense<0.000000e+00> : vector<8x768xf32>
    %29 = tpu.matmul %19, %28, %cst_19 {dimension_numbers = #tpu.dot_dimension_numbers<[1], [0], [0], [1], [0, 0, 1, 1], [], []>} : vector<8x80xf32>, vector<80x768xf32>, vector<8x768xf32> -> vector<8x768xf32>
    %c0_20 = arith.constant 0 : index
    %c0_21 = arith.constant 0 : index
    %30 = vector.load %arg5[%c0_20, %c0_21] : memref<8x768xf32, #tpu.memory_space<vmem>>, vector<8x768xf32>
    tpu.vector_store %arg5[%c0_20, %c0_21], %29 {strides = array<i32>} : memref<8x768xf32, #tpu.memory_space<vmem>>, vector<8x768xf32>,
    return
  }
}

</mosaic_0001>

<bundles_post_ra>
// kernel: feature_extractor_forward.1
= control target key start
LH: loop header
LB: loop body
LE: loop exit
PB: predicated region body
PF: predicated region fallthrough
CT: control target
= control target key end

     0   :  { %v838_v2 = vmov 1.0   ;;  %s839_s22 = smov 109   ;;  %s840_s25 = smov 110   ;;  %v846_v7 = vmov 0.0   ;;  %v39_v8 = vlaneseq  ;;  %vm181_vm8 = vcmask 654336   ;;  %s1534_s0 = inlined_call_operand.vmem [shape: f32[8,768], index: 0, kind: input, shape index: {}]   ;;  %s1535_s2 = inlined_call_operand.vmem [shape: f32[8,80], index: 2, kind: input, shape index: {}]   ;;  %s1536_s1 = inlined_call_operand.vmem [shape: f32[1,768], index: 1, kind: input, shape index: {}]   ;;  %s1537_s4 = inlined_call_operand.vmem [shape: f32[8,768], index: 4, kind: output, shape index: {0}]   ;;  %s1538_s3 = inlined_call_operand.vmem [shape: f32[8,80], index: 3, kind: input, shape index: {}]   ;;  %s1539_s5 = inlined_call_operand.vmem [shape: f32[8,768], index: 5, kind: output, shape index: {1}]  }
   0x1   :  { %v881_v0 = vld [vmem:[%s1534_s0 + $0x8] sm:$0xff]  ;;  %v886_v1 = vld [vmem:[%s1534_s0] sm:$0xff]  ;;  %197 = vmatprep.subr.mxu0 %v838_v2  ;;  %268 = vmatprep.subr.mxu1 %v838_v2  ;;  %v897_v3 = vld [vmem:[%s1534_s0 + $0x10] sm:$0xff]  ;;  %s841_s26 = smov 111   ;;  %s842_s27 = smov 127  }
   0x2   :  { %164 = vrot.lane.b32.xlu0 %v881_v0, %s839_s22  ;;  %162 = vrot.lane.b32.xlu1 %v886_v1, %s839_s22  ;;  %s843_s28 = smov 1   ;;  %v928_v4 = vld [vmem:[%s1534_s0 + $0x28] sm:$0xff]  ;;  %v933_v5 = vld [vmem:[%s1534_s0 + $0x18] sm:$0xff]  ;;  %s844_s10 = smov 17   ;;  %v1011_v9 = vand.u32 127, %v39_v8 }
   0x3   :  { %198 = vmatpush1.msra.mxu0 %v838_v2  ;;  %269 = vmatpush1.msra.mxu1 %v838_v2  ;;  %v942_v6 = vld [vmem:[%s1534_s0 + $0x20] sm:$0xff]  ;;  %s845_s0 = smov 18   ;;  %s847_s11 = smov 19  }
   0x4   :  { %249 = vmatprep.mubr.f32.mxu0 %v846_v7  ;;  %320 = vmatprep.mubr.f32.mxu1 %v846_v7  ;;  %vm174_vm0 = vcmp.lt.s32.totalorder %v1011_v9, 109  ;;  %vm155_vm1 = vcmp.lt.s32.totalorder %v1011_v9, 110  ;;  %vm136_vm2 = vcmp.lt.s32.totalorder %v1011_v9, 111  ;;  %vm117_vm3 = vcmp.lt.s32.totalorder %v1011_v9, 127  ;;  %v1109_v62 = vld [vmem:[%s1535_s2] sm:$0xff] }
   0x5   :  { %vm98_vm4 = vcmp.lt.s32.totalorder %v1011_v9, 1  ;;  %vm79_vm5 = vcmp.lt.s32.totalorder %v1011_v9, 17  ;;  %vm60_vm6 = vcmp.lt.s32.totalorder %v1011_v9, 18  ;;  %vm41_vm7 = vcmp.lt.s32.totalorder %v1011_v9, 19 }
   0x6   :  { %166 = vrot.lane.b32.xlu0 %v897_v3, %s839_s22  ;;  %145 = vrot.lane.b32.xlu1 %v881_v0, %s840_s25 }
   0xa   :  { %147 = vrot.lane.b32.xlu0 %v897_v3, %s840_s25  ;;  %143 = vrot.lane.b32.xlu1 %v886_v1, %s840_s25 }
   0xe   :  { %126 = vrot.lane.b32.xlu0 %v881_v0, %s841_s26  ;;  %128 = vrot.lane.b32.xlu1 %v897_v3, %s841_s26 }
  0x12   :  { %124 = vrot.lane.b32.xlu0 %v886_v1, %s841_s26  ;;  %107 = vrot.lane.b32.xlu1 %v881_v0, %s842_s27 }
  0x16   :  { %109 = vrot.lane.b32.xlu0 %v897_v3, %s842_s27  ;;  %105 = vrot.lane.b32.xlu1 %v886_v1, %s842_s27 }
  0x1a   :  { %86 = vrot.lane.b32.xlu0 %v886_v1, %s843_s28  ;;  %88 = vrot.lane.b32.xlu1 %v881_v0, %s843_s28 }
  0x1e   :  { %96 = vrot.lane.b32.xlu0 %v928_v4, %s843_s28  ;;  %168 = vrot.lane.b32.xlu1 %v933_v5, %s839_s22 }
  0x22   :  { %170 = vrot.lane.b32.xlu0 %v942_v6, %s839_s22  ;;  %67 = vrot.lane.b32.xlu1 %v886_v1, %s844_s10 }
  0x26   :  { %69 = vrot.lane.b32.xlu0 %v881_v0, %s844_s10  ;;  %77 = vrot.lane.b32.xlu1 %v928_v4, %s844_s10 }
  0x2a   :  { %149 = vrot.lane.b32.xlu0 %v933_v5, %s840_s25  ;;  %151 = vrot.lane.b32.xlu1 %v942_v6, %s840_s25 }
  0x2e   :  { %48 = vrot.lane.b32.xlu0 %v886_v1, %s845_s0  ;;  %50 = vrot.lane.b32.xlu1 %v881_v0, %s845_s0 }
  0x32   :  { %58 = vrot.lane.b32.xlu0 %v928_v4, %s845_s0  ;;  %130 = vrot.lane.b32.xlu1 %v933_v5, %s841_s26 }
  0x36   :  { %132 = vrot.lane.b32.xlu0 %v942_v6, %s841_s26  ;;  %27 = vrot.lane.b32.xlu1 %v886_v1, %s847_s11 }
  0x3a   :  { %29 = vrot.lane.b32.xlu0 %v881_v0, %s847_s11  ;;  %37 = vrot.lane.b32.xlu1 %v928_v4, %s847_s11 }
  0x3e   :  { %111 = vrot.lane.b32.xlu0 %v933_v5, %s842_s27  ;;  %113 = vrot.lane.b32.xlu1 %v942_v6, %s842_s27 }
  0x42   :  { %172 = vrot.lane.b32.xlu0 %v928_v4, %s839_s22  ;;  %90 = vrot.lane.b32.xlu1 %v897_v3, %s843_s28 }
  0x46   :  { %92 = vrot.lane.b32.xlu0 %v933_v5, %s843_s28  ;;  %153 = vrot.lane.b32.xlu1 %v928_v4, %s840_s25 }
  0x4a   :  { %71 = vrot.lane.b32.xlu0 %v897_v3, %s844_s10  ;;  %73 = vrot.lane.b32.xlu1 %v933_v5, %s844_s10 }
  0x4e   :  { %134 = vrot.lane.b32.xlu0 %v928_v4, %s841_s26  ;;  %52 = vrot.lane.b32.xlu1 %v897_v3, %s845_s0 }
  0x52   :  { %54 = vrot.lane.b32.xlu0 %v933_v5, %s845_s0  ;;  %115 = vrot.lane.b32.xlu1 %v928_v4, %s842_s27 }
  0x56   :  { %31 = vrot.lane.b32.xlu0 %v897_v3, %s847_s11  ;;  %33 = vrot.lane.b32.xlu1 %v933_v5, %s847_s11 }
  0x5a   :  { %94 = vrot.lane.b32.xlu0 %v942_v6, %s843_s28  ;;  %75 = vrot.lane.b32.xlu1 %v942_v6, %s844_s10 }
  0x5e   :  { %56 = vrot.lane.b32.xlu0 %v942_v6, %s845_s0  ;;  %35 = vrot.lane.b32.xlu1 %v942_v6, %s847_s11 }
  0x74   :  { %v165_v10 = vpop.permute.xlu0 %164  ;;  %v1013_v11 = vpop.permute.xlu1 %162 }
  0x75   :  { %v179_v15 = vsel %vm174_vm0, %v1013_v11, %v165_v10 }
  0x78   :  { %v167_v12 = vpop.permute.xlu0 %166  ;;  %v146_v13 = vpop.permute.xlu1 %145 }
  0x79   :  { %v178_v14 = vsel %vm174_vm0, %v165_v10, %v167_v12 }
  0x7a   :  { %199 = vmatprep.subr.mxu0 %v178_v14 }
  0x7b   :  { %200 = vmatpush1.msra.mxu0 %v179_v15 }
  0x7c   :  { %v148_v16 = vpop.permute.xlu0 %147  ;;  %v1022_v17 = vpop.permute.xlu1 %143 }
  0x7d   :  { %v159_v18 = vsel %vm155_vm1, %v146_v13, %v148_v16  ;;  %v160_v19 = vsel %vm155_vm1, %v1022_v17, %v146_v13 }
  0x7e   :  { %201 = vmatprep.subr.mxu0 %v159_v18 }
  0x7f   :  { %202 = vmatpush1.msra.mxu0 %v160_v19 }
  0x80   :  { %v127_v20 = vpop.permute.xlu0 %126  ;;  %v129_v21 = vpop.permute.xlu1 %128 }
  0x81   :  { %v140_v22 = vsel %vm136_vm2, %v127_v20, %v129_v21 }
  0x82   :  { %203 = vmatprep.subr.mxu0 %v140_v22 }
  0x84   :  { %v1032_v23 = vpop.permute.xlu0 %124  ;;  %v108_v24 = vpop.permute.xlu1 %107 }
  0x85   :  { %v141_v25 = vsel %vm136_vm2, %v1032_v23, %v127_v20 }
  0x86   :  { %204 = vmatpush1.msra.mxu0 %v141_v25 }
  0x88   :  { %v1038_v26 = vpop.permute.xlu0 %109  ;;  %v1040_v27 = vpop.permute.xlu1 %105 }
  0x89   :  { %v121_v28 = vsel %vm117_vm3, %v108_v24, %v1038_v26  ;;  %v122_v29 = vsel %vm117_vm3, %v1040_v27, %v108_v24 }
  0x8a   :  { %205 = vmatprep.subr.mxu0 %v121_v28 }
  0x8b   :  { %206 = vmatpush1.msra.mxu0 %v122_v29 }
  0x8c   :  { %v87_v30 = vpop.permute.xlu0 %86  ;;  %207 = vmatprep.subr.mxu0 %v881_v0  ;;  %v1050_v31 = vpop.permute.xlu1 %88 }
  0x8d   :  { %208 = vmatpush1.msra.mxu0 %v886_v1  ;;  %v103_v32 = vsel %vm98_vm4, %v87_v30, %v1050_v31 }
  0x8e   :  { %209 = vmatprep.subr.mxu0 %v103_v32 }
  0x90   :  { %v1056_v33 = vpop.permute.xlu0 %96  ;;  %v169_v34 = vpop.permute.xlu1 %168 }
  0x91   :  { %v104_v35 = vsel %vm98_vm4, %v1056_v33, %v87_v30  ;;  %v177_v39 = vsel %vm174_vm0, %v167_v12, %v169_v34 }
  0x92   :  { %210 = vmatpush1.msra.mxu0 %v104_v35 }
  0x94   :  { %v171_v36 = vpop.permute.xlu0 %170  ;;  %v68_v37 = vpop.permute.xlu1 %67 }
  0x95   :  { %v176_v38 = vsel %vm174_vm0, %v169_v34, %v171_v36 }
  0x96   :  { %270 = vmatprep.subr.mxu1 %v176_v38 }
  0x97   :  { %271 = vmatpush1.msra.mxu1 %v177_v39 }
  0x98   :  { %v1066_v40 = vpop.permute.xlu0 %69  ;;  %v1068_v41 = vpop.permute.xlu1 %77 }
  0x99   :  { %v84_v42 = vsel %vm79_vm5, %v68_v37, %v1066_v40  ;;  %v85_v43 = vsel %vm79_vm5, %v1068_v41, %v68_v37 }
  0x9a   :  { %211 = vmatprep.subr.mxu0 %v84_v42 }
  0x9b   :  { %212 = vmatpush1.msra.mxu0 %v85_v43 }
  0x9c   :  { %v150_v44 = vpop.permute.xlu0 %149  ;;  %v152_v45 = vpop.permute.xlu1 %151 }
  0x9d   :  { %v157_v46 = vsel %vm155_vm1, %v150_v44, %v152_v45  ;;  %v158_v47 = vsel %vm155_vm1, %v148_v16, %v150_v44 }
  0x9e   :  { %272 = vmatprep.subr.mxu1 %v157_v46 }
  0x9f   :  { %273 = vmatpush1.msra.mxu1 %v158_v47  ;;  %v400_v47 = vshrl.u32 %v39_v8, 7 }
  0xa0   :  { %v49_v48 = vpop.permute.xlu0 %48  ;;  %v1081_v49 = vpop.permute.xlu1 %50 }
  0xa1   :  { %v65_v50 = vsel %vm60_vm6, %v49_v48, %v1081_v49  ;;  %v409_v8 = vsub.s32 2, %v400_v47 }
  0xa2   :  { %213 = vmatprep.subr.mxu0 %v65_v50  ;;  %v405_v50 = vsub.s32 1, %v400_v47 }
  0xa4   :  { %v1086_v51 = vpop.permute.xlu0 %58  ;;  %v131_v52 = vpop.permute.xlu1 %130 }
  0xa5   :  { %v66_v53 = vsel %vm60_vm6, %v1086_v51, %v49_v48  ;;  %v139_v57 = vsel %vm136_vm2, %v129_v21, %v131_v52  ;;  %v401_v48 = vsub.s32 0, %v400_v47 }
  0xa6   :  { %214 = vmatpush1.msra.mxu0 %v66_v53 }
  0xa8   :  { %v133_v54 = vpop.permute.xlu0 %132  ;;  %v28_v55 = vpop.permute.xlu1 %27 }
  0xa9   :  { %v138_v56 = vsel %vm136_vm2, %v131_v52, %v133_v54 }
  0xaa   :  { %274 = vmatprep.subr.mxu1 %v138_v56 }
  0xab   :  { %275 = vmatpush1.msra.mxu1 %v139_v57 }
  0xac   :  { %v1096_v58 = vpop.permute.xlu0 %29  ;;  %v1098_v59 = vpop.permute.xlu1 %37 }
  0xad   :  { %v46_v60 = vsel %vm41_vm7, %v28_v55, %v1096_v58  ;;  %v47_v61 = vsel %vm41_vm7, %v1098_v59, %v28_v55 }
  0xae   :  { %215 = vmatprep.subr.mxu0 %v46_v60 }
  0xaf   :  { %216 = vmatpush1.msra.mxu0 %v47_v61 }
  0xb0   :  { %v112_v63 = vpop.permute.xlu0 %111  ;;  %v114_v0 = vpop.permute.xlu1 %113  ;;  %339 = vmatprep.subr.mxu0 %v838_v2  ;;  %822 = vmatmul.mubr.msk.f32.vlgmr.msra.gmra.mxu0 %vm181_vm8, %v1109_v62 }
  0xb1   :  { %v119_v1 = vsel %vm117_vm3, %v112_v63, %v114_v0  ;;  %v120_v10 = vsel %vm117_vm3, %v1038_v26, %v112_v63  ;;  %340 = vmatpush1.msra.mxu0 %v838_v2  ;;  %391 = vmatprep.mubr.f32.mxu0 %v846_v7 }
  0xb2   :  { %276 = vmatprep.subr.mxu1 %v119_v1 }
  0xb3   :  { %277 = vmatpush1.msra.mxu1 %v120_v10  ;;  %v417_v10 = vsub.s32 4, %v400_v47 }
  0xb4   :  { %v173_v12 = vpop.permute.xlu0 %172  ;;  %v91_v13 = vpop.permute.xlu1 %90  ;;  %278 = vmatprep.subr.mxu1 %v933_v5 }
  0xb5   :  { %v175_v14 = vsel %vm174_vm0, %v171_v36, %v173_v12  ;;  %v180_v15 = vsel %vm174_vm0, %v173_v12, %v1013_v11  ;;  %279 = vmatpush1.msra.mxu1 %v897_v3  ;;  %v102_v3 = vsel %vm98_vm4, %v1050_v31, %v91_v13  ;;  %v421_v12 = vsub.s32 5, %v400_v47 }
  0xb6   :  { %341 = vmatprep.subr.mxu0 %v180_v15 }
  0xb7   :  { %342 = vmatpush1.msra.mxu0 %v175_v14 }
  0xb8   :  { %v93_v16 = vpop.permute.xlu0 %92  ;;  %v154_v18 = vpop.permute.xlu1 %153 }
  0xb9   :  { %v156_v19 = vsel %vm155_vm1, %v152_v45, %v154_v18  ;;  %v101_v20 = vsel %vm98_vm4, %v91_v13, %v93_v16  ;;  %v161_v5 = vsel %vm155_vm1, %v154_v18, %v1022_v17 }
  0xba   :  { %280 = vmatprep.subr.mxu1 %v101_v20  ;;  %343 = vmatprep.subr.mxu0 %v161_v5 }
  0xbb   :  { %281 = vmatpush1.msra.mxu1 %v102_v3  ;;  %344 = vmatpush1.msra.mxu0 %v156_v19 }
  0xbc   :  { %v72_v11 = vpop.permute.xlu0 %71  ;;  %v74_v21 = vpop.permute.xlu1 %73 }
  0xbd   :  { %v82_v22 = vsel %vm79_vm5, %v72_v11, %v74_v21  ;;  %v83_v24 = vsel %vm79_vm5, %v1066_v40, %v72_v11 }
  0xbe   :  { %282 = vmatprep.subr.mxu1 %v82_v22 }
  0xbf   :  { %283 = vmatpush1.msra.mxu1 %v83_v24 }
  0xc0   :  { %v135_v17 = vpop.permute.xlu0 %134  ;;  %v53_v25 = vpop.permute.xlu1 %52 }
  0xc1   :  { %v137_v26 = vsel %vm136_vm2, %v133_v54, %v135_v17  ;;  %v142_v28 = vsel %vm136_vm2, %v135_v17, %v1032_v23  ;;  %v64_v23 = vsel %vm60_vm6, %v1081_v49, %v53_v25  ;;  %v25_v49 = vld [vmem:[%s1536_s1] sm:$0x3f] }
  0xc2   :  { %345 = vmatprep.subr.mxu0 %v142_v28  ;;  %v406_v52 = vrot.slane %v25_v49, %v405_v50  ;;  %v418_v13 = vrot.slane %v25_v49, %v417_v10  ;;  %v422_v14 = vrot.slane %v25_v49, %v421_v12 }
  0xc3   :  { %346 = vmatpush1.msra.mxu0 %v137_v26 }
  0xc4   :  { %v55_v29 = vpop.permute.xlu0 %54  ;;  %v116_v30 = vpop.permute.xlu1 %115 }
  0xc5   :  { %v118_v31 = vsel %vm117_vm3, %v114_v0, %v116_v30  ;;  %v63_v32 = vsel %vm60_vm6, %v53_v25, %v55_v29  ;;  %v123_v34 = vsel %vm117_vm3, %v116_v30, %v1040_v27 }
  0xc6   :  { %284 = vmatprep.subr.mxu1 %v63_v32  ;;  %347 = vmatprep.subr.mxu0 %v123_v34 }
  0xc7   :  { %285 = vmatpush1.msra.mxu1 %v64_v23  ;;  %348 = vmatpush1.msra.mxu0 %v118_v31 }
  0xc8   :  { %v32_v35 = vpop.permute.xlu0 %31  ;;  %v34_v36 = vpop.permute.xlu1 %33  ;;  %349 = vmatprep.subr.mxu0 %v928_v4 }
  0xc9   :  { %v44_v37 = vsel %vm41_vm7, %v32_v35, %v34_v36  ;;  %v45_v38 = vsel %vm41_vm7, %v1096_v58, %v32_v35  ;;  %350 = vmatpush1.msra.mxu0 %v942_v6  ;;  %v413_v58 = vsub.s32 3, %v400_v47 }
  0xca   :  { %286 = vmatprep.subr.mxu1 %v44_v37 }
  0xcb   :  { %287 = vmatpush1.msra.mxu1 %v45_v38  ;;  %v414_v60 = vrot.slane %v25_v49, %v413_v58 }
  0xcc   :  { %v95_v27 = vpop.permute.xlu0 %94  ;;  %823 = vmatmul.mubr.msk.f32.vlgmr.msra.gmra.mxu1 %vm181_vm8, %v1109_v62  ;;  %v76_v39 = vpop.permute.xlu1 %75  ;;  %607 = vmatprep.subr.mxu1 %v838_v2 }
  0xcd   :  { %v100_v4 = vsel %vm98_vm4, %v93_v16, %v95_v27  ;;  %v99_v40 = vsel %vm98_vm4, %v95_v27, %v1056_v33  ;;  %608 = vmatpush1.msra.mxu1 %v838_v2  ;;  %659 = vmatprep.mubr.f32.mxu1 %v846_v7  ;;  %v80_v6 = vsel %vm79_vm5, %v76_v39, %v1068_v41 }
  0xce   :  { %351 = vmatprep.subr.mxu0 %v99_v40  ;;  %v81_v42 = vsel %vm79_vm5, %v74_v21, %v76_v39 }
  0xcf   :  { %352 = vmatpush1.msra.mxu0 %v100_v4 }
  0xd0   :  { %v57_v43 = vpop.permute.xlu0 %56  ;;  %353 = vmatprep.subr.mxu0 %v80_v6  ;;  %v36_v44 = vpop.permute.xlu1 %35 }
  0xd1   :  { %v62_v45 = vsel %vm60_vm6, %v55_v29, %v57_v43  ;;  %354 = vmatpush1.msra.mxu0 %v81_v42  ;;  %v61_v33 = vsel %vm60_vm6, %v57_v43, %v1086_v51  ;;  %v42_v41 = vsel %vm41_vm7, %v36_v44, %v1098_v59  ;;  %v43_v46 = vsel %vm41_vm7, %v34_v36, %v36_v44 }
  0xd2   :  { %355 = vmatprep.subr.mxu0 %v61_v33  ;;  %v402_v51 = vrot.slane %v25_v49, %v401_v48  ;;  %v410_v59 = vrot.slane %v25_v49, %v409_v8 }
  0xd3   :  { %356 = vmatpush1.msra.mxu0 %v62_v45 }
  0xd4   :  { %357 = vmatprep.subr.mxu0 %v42_v41 }
  0xd5   :  { %358 = vmatpush1.msra.mxu0 %v43_v46 }
  0xd6   :  { %824 = vmatmul.mubr.msk.f32.vlgmr.msra.gmra.mxu0 %vm181_vm8, %v1109_v62  ;;  %678 = vmatprep.subr.mxu0 %v838_v2 }
  0xd7   :  { %679 = vmatpush1.msra.mxu0 %v838_v2  ;;  %730 = vmatprep.mubr.f32.mxu0 %v846_v7 }
 0x170   :  { %v251_v53 = vpop.f32.mrf.mxu0 }
 0x171   :  { %v429_v54 = vmul.f32 %v402_v51, %v251_v53 }
 0x172   :  { %v253_v55 = vpop.f32.mrf.mxu0 }
 0x173   :  { %435 = vst [vmem:[%s1537_s4] sm:$0xff] %v429_v54  ;;  %v1202_v56 = vmax.f32 %v429_v54, 0.0  ;;  %v430_v57 = vmul.f32 %v406_v52, %v253_v55 }
 0x175   :  { %436 = vst [vmem:[%s1537_s4 + $0x8] sm:$0xff] %v430_v57  ;;  %574 = vrot.lane.b32.xlu0 %v1202_v56, %s839_s22  ;;  %v1247_v20 = vmax.f32 %v430_v57, 0.0 }
 0x18c   :  { %v322_v61 = vpop.f32.mrf.mxu1 }
 0x18d   :  { %v431_v62 = vmul.f32 %v410_v59, %v322_v61 }
 0x18e   :  { %v324_v63 = vpop.f32.mrf.mxu1 }
 0x18f   :  { %437 = vst [vmem:[%s1537_s4 + $0x10] sm:$0xff] %v431_v62  ;;  %v1212_v0 = vmax.f32 %v431_v62, 0.0  ;;  %v432_v1 = vmul.f32 %v414_v60, %v324_v63 }
 0x191   :  { %438 = vst [vmem:[%s1537_s4 + $0x18] sm:$0xff] %v432_v1  ;;  %560 = vrot.lane.b32.xlu0 %v1212_v0, %s840_s25  ;;  %578 = vrot.lane.b32.xlu1 %v1212_v0, %s839_s22  ;;  %v1265_v5 = vmax.f32 %v432_v1, 0.0 }
 0x195   :  { %538 = vrot.lane.b32.xlu0 %v1202_v56, %s841_s26  ;;  %556 = vrot.lane.b32.xlu1 %v1202_v56, %s840_s25 }
 0x196   :  { %v393_v15 = vpop.f32.mrf.mxu0 }
 0x197   :  { %v433_v16 = vmul.f32 %v418_v13, %v393_v15 }
 0x198   :  { %v395_v18 = vpop.f32.mrf.mxu0 }
 0x199   :  { %524 = vrot.lane.b32.xlu0 %v1212_v0, %s842_s27  ;;  %542 = vrot.lane.b32.xlu1 %v1212_v0, %s841_s26  ;;  %439 = vst [vmem:[%s1537_s4 + $0x20] sm:$0xff] %v433_v16  ;;  %v434_v19 = vmul.f32 %v422_v14, %v395_v18  ;;  %v1271_v3 = vmax.f32 %v433_v16, 0.0 }
 0x19b   :  { %440 = vst [vmem:[%s1537_s4 + $0x28] sm:$0xff] %v434_v19  ;;  %v1289_v11 = vmax.f32 %v434_v19, 0.0 }
 0x19d   :  { %502 = vrot.lane.b32.xlu0 %v1202_v56, %s843_s28  ;;  %520 = vrot.lane.b32.xlu1 %v1202_v56, %s842_s27 }
 0x1a1   :  { %466 = vrot.lane.b32.xlu0 %v1202_v56, %s845_s0  ;;  %484 = vrot.lane.b32.xlu1 %v1202_v56, %s844_s10 }
 0x1a5   :  { %506 = vrot.lane.b32.xlu0 %v1212_v0, %s843_s28  ;;  %448 = vrot.lane.b32.xlu1 %v1202_v56, %s847_s11 }
 0x1a9   :  { %576 = vrot.lane.b32.xlu0 %v1247_v20, %s839_s22  ;;  %488 = vrot.lane.b32.xlu1 %v1212_v0, %s844_s10 }
 0x1ad   :  { %540 = vrot.lane.b32.xlu0 %v1247_v20, %s841_s26  ;;  %558 = vrot.lane.b32.xlu1 %v1247_v20, %s840_s25 }
 0x1b1   :  { %486 = vrot.lane.b32.xlu0 %v1247_v20, %s844_s10  ;;  %522 = vrot.lane.b32.xlu1 %v1247_v20, %s842_s27 }
 0x1b5   :  { %450 = vrot.lane.b32.xlu0 %v1247_v20, %s847_s11  ;;  %504 = vrot.lane.b32.xlu1 %v1247_v20, %s843_s28 }
 0x1b9   :  { %468 = vrot.lane.b32.xlu1 %v1247_v20, %s845_s0  ;;  %580 = vrot.lane.b32.xlu0 %v1265_v5, %s839_s22 }
 0x1bd   :  { %562 = vrot.lane.b32.xlu1 %v1265_v5, %s840_s25  ;;  %544 = vrot.lane.b32.xlu0 %v1265_v5, %s841_s26 }
 0x1c1   :  { %526 = vrot.lane.b32.xlu1 %v1265_v5, %s842_s27  ;;  %564 = vrot.lane.b32.xlu0 %v1271_v3, %s840_s25 }
 0x1c5   :  { %508 = vrot.lane.b32.xlu1 %v1265_v5, %s843_s28  ;;  %528 = vrot.lane.b32.xlu0 %v1271_v3, %s842_s27 }
 0x1c9   :  { %510 = vrot.lane.b32.xlu0 %v1271_v3, %s843_s28  ;;  %582 = vrot.lane.b32.xlu1 %v1271_v3, %s839_s22 }
 0x1cd   :  { %546 = vrot.lane.b32.xlu1 %v1271_v3, %s841_s26  ;;  %512 = vrot.lane.b32.xlu0 %v1289_v11, %s843_s28 }
 0x1d1   :  { %494 = vrot.lane.b32.xlu1 %v1289_v11, %s844_s10  ;;  %476 = vrot.lane.b32.xlu0 %v1289_v11, %s845_s0 }
 0x1d5   :  { %492 = vrot.lane.b32.xlu1 %v1271_v3, %s844_s10  ;;  %490 = vrot.lane.b32.xlu0 %v1265_v5, %s844_s10 }
 0x1d9   :  { %458 = vrot.lane.b32.xlu1 %v1289_v11, %s847_s11  ;;  %584 = vrot.lane.b32.xlu0 %v1289_v11, %s839_s22 }
 0x1dd   :  { %566 = vrot.lane.b32.xlu1 %v1289_v11, %s840_s25  ;;  %548 = vrot.lane.b32.xlu0 %v1289_v11, %s841_s26 }
 0x1e1   :  { %530 = vrot.lane.b32.xlu1 %v1289_v11, %s842_s27  ;;  %470 = vrot.lane.b32.xlu0 %v1212_v0, %s845_s0 }
 0x1e5   :  { %472 = vrot.lane.b32.xlu1 %v1265_v5, %s845_s0  ;;  %474 = vrot.lane.b32.xlu0 %v1271_v3, %s845_s0 }
 0x1e7   :  { %v1325_v21 = vpop.permute.xlu0 %574 }
 0x1e9   :  { %452 = vrot.lane.b32.xlu1 %v1212_v0, %s847_s11  ;;  %454 = vrot.lane.b32.xlu0 %v1265_v5, %s847_s11 }
 0x1ed   :  { %456 = vrot.lane.b32.xlu1 %v1271_v3, %s847_s11 }
 0x203   :  { %v561_v22 = vpop.permute.xlu0 %560  ;;  %v579_v24 = vpop.permute.xlu1 %578 }
 0x207   :  { %v1327_v17 = vpop.permute.xlu0 %538  ;;  %v1329_v25 = vpop.permute.xlu1 %556 }
 0x20b   :  { %v1331_v26 = vpop.permute.xlu0 %524  ;;  %v543_v28 = vpop.permute.xlu1 %542 }
 0x20f   :  { %v503_v29 = vpop.permute.xlu0 %502  ;;  %v1333_v30 = vpop.permute.xlu1 %520 }
 0x213   :  { %v1335_v31 = vpop.permute.xlu0 %466  ;;  %v1337_v32 = vpop.permute.xlu1 %484 }
 0x217   :  { %v1339_v34 = vpop.permute.xlu0 %506  ;;  %v1341_v23 = vpop.permute.xlu1 %448 }
 0x21b   :  { %v577_v35 = vpop.permute.xlu0 %576  ;;  %v1343_v36 = vpop.permute.xlu1 %488 }
 0x21c   :  { %v590_v37 = vsel %vm174_vm0, %v1325_v21, %v577_v35  ;;  %v589_v38 = vsel %vm174_vm0, %v577_v35, %v579_v24 }
 0x21d   :  { %609 = vmatprep.subr.mxu1 %v589_v38 }
 0x21e   :  { %610 = vmatpush1.msra.mxu1 %v590_v37 }
 0x21f   :  { %v541_v27 = vpop.permute.xlu0 %540  ;;  %v559_v39 = vpop.permute.xlu1 %558 }
 0x220   :  { %v572_v4 = vsel %vm155_vm1, %v1329_v25, %v559_v39  ;;  %v571_v40 = vsel %vm155_vm1, %v559_v39, %v561_v22  ;;  %v553_v6 = vsel %vm136_vm2, %v541_v27, %v543_v28  ;;  %v554_v42 = vsel %vm136_vm2, %v1327_v17, %v541_v27 }
 0x221   :  { %611 = vmatprep.subr.mxu1 %v571_v40 }
 0x222   :  { %612 = vmatpush1.msra.mxu1 %v572_v4 }
 0x223   :  { %v1360_v43 = vpop.permute.xlu0 %486  ;;  %613 = vmatprep.subr.mxu1 %v553_v6  ;;  %v523_v44 = vpop.permute.xlu1 %522 }
 0x224   :  { %v536_v45 = vsel %vm117_vm3, %v1333_v30, %v523_v44  ;;  %614 = vmatpush1.msra.mxu1 %v554_v42  ;;  %v535_v33 = vsel %vm117_vm3, %v523_v44, %v1331_v26  ;;  %v500_v12 = vsel %vm79_vm5, %v1337_v32, %v1360_v43 }
 0x225   :  { %615 = vmatprep.subr.mxu1 %v535_v33 }
 0x226   :  { %616 = vmatpush1.msra.mxu1 %v536_v45 }
 0x227   :  { %v1368_v41 = vpop.permute.xlu0 %450  ;;  %617 = vmatprep.subr.mxu1 %v1247_v20  ;;  %v505_v46 = vpop.permute.xlu1 %504 }
 0x228   :  { %618 = vmatpush1.msra.mxu1 %v1202_v56  ;;  %v518_v47 = vsel %vm98_vm4, %v503_v29, %v505_v46 }
 0x229   :  { %619 = vmatprep.subr.mxu1 %v518_v47 }
 0x22b   :  { %v581_v48 = vpop.permute.xlu0 %580  ;;  %v1374_v49 = vpop.permute.xlu1 %468 }
 0x22c   :  { %v588_v58 = vsel %vm174_vm0, %v579_v24, %v581_v48  ;;  %v482_v19 = vsel %vm60_vm6, %v1335_v31, %v1374_v49 }
 0x22f   :  { %v545_v50 = vpop.permute.xlu0 %544  ;;  %v563_v51 = vpop.permute.xlu1 %562 }
 0x230   :  { %v570_v60 = vsel %vm155_vm1, %v561_v22, %v563_v51  ;;  %v552_v10 = vsel %vm136_vm2, %v543_v28, %v545_v50  ;;  %v464_v28 = vsel %vm41_vm7, %v1341_v23, %v1368_v41 }
 0x233   :  { %v1376_v52 = vpop.permute.xlu0 %564  ;;  %v527_v53 = vpop.permute.xlu1 %526 }
 0x234   :  { %v569_v59 = vsel %vm155_vm1, %v563_v51, %v1376_v52  ;;  %v534_v14 = vsel %vm117_vm3, %v1331_v26, %v527_v53 }
 0x237   :  { %v1378_v54 = vpop.permute.xlu0 %528  ;;  %v1380_v55 = vpop.permute.xlu1 %508 }
 0x238   :  { %v533_v13 = vsel %vm117_vm3, %v527_v53, %v1378_v54  ;;  %v516_v22 = vsel %vm98_vm4, %v1339_v34, %v1380_v55 }
 0x23b   :  { %v1382_v57 = vpop.permute.xlu0 %510  ;;  %v583_v8 = vpop.permute.xlu1 %582 }
 0x23c   :  { %v587_v56 = vsel %vm174_vm0, %v581_v48, %v583_v8 }
 0x23d   :  { %680 = vmatprep.subr.mxu0 %v587_v56 }
 0x23e   :  { %681 = vmatpush1.msra.mxu0 %v588_v58 }
 0x23f   :  { %v1393_v61 = vpop.permute.xlu0 %512  ;;  %682 = vmatprep.subr.mxu0 %v569_v59  ;;  %v547_v62 = vpop.permute.xlu1 %546 }
 0x240   :  { %v519_v63 = vsel %vm98_vm4, %v1393_v61, %v503_v29  ;;  %683 = vmatpush1.msra.mxu0 %v570_v60  ;;  %v551_v1 = vsel %vm136_vm2, %v545_v50, %v547_v62  ;;  %v499_v29 = vsel %vm79_vm5, %v1360_v43, %v1343_v36 }
 0x241   :  { %620 = vmatpush1.msra.mxu1 %v519_v63  ;;  %684 = vmatprep.subr.mxu0 %v551_v1 }
 0x242   :  { %621 = vmatprep.subr.mxu1 %v500_v12  ;;  %685 = vmatpush1.msra.mxu0 %v552_v10 }
 0x243   :  { %v1412_v15 = vpop.permute.xlu0 %476  ;;  %686 = vmatprep.subr.mxu0 %v533_v13  ;;  %v1414_v16 = vpop.permute.xlu1 %494 }
 0x244   :  { %v501_v18 = vsel %vm79_vm5, %v1414_v16, %v1337_v32  ;;  %687 = vmatpush1.msra.mxu0 %v534_v14  ;;  %v483_v20 = vsel %vm60_vm6, %v1412_v15, %v1335_v31 }
 0x245   :  { %622 = vmatpush1.msra.mxu1 %v501_v18  ;;  %688 = vmatprep.subr.mxu0 %v1265_v5  ;;  %v517_v5 = vsel %vm98_vm4, %v505_v46, %v1339_v34  ;;  %v447_v34 = vld [vmem:[%s1538_s3] sm:$0xff] }
 0x246   :  { %623 = vmatprep.subr.mxu1 %v482_v19  ;;  %689 = vmatpush1.msra.mxu0 %v1212_v0 }
 0x247   :  { %v491_v24 = vpop.permute.xlu0 %490  ;;  %624 = vmatpush1.msra.mxu1 %v483_v20  ;;  %690 = vmatprep.subr.mxu0 %v516_v22  ;;  %v493_v26 = vpop.permute.xlu1 %492 }
 0x248   :  { %625 = vmatprep.subr.mxu1 %v464_v28  ;;  %691 = vmatpush1.msra.mxu0 %v517_v5  ;;  %v498_v0 = vsel %vm79_vm5, %v1343_v36, %v491_v24  ;;  %v496_v33 = vsel %vm79_vm5, %v493_v26, %v1414_v16 }
 0x249   :  { %692 = vmatprep.subr.mxu0 %v498_v0 }
 0x24a   :  { %693 = vmatpush1.msra.mxu0 %v499_v29 }
 0x24b   :  { %v585_v31 = vpop.permute.xlu0 %584  ;;  %v459_v32 = vpop.permute.xlu1 %458 }
 0x24c   :  { %v465_v35 = vsel %vm41_vm7, %v459_v32, %v1341_v23  ;;  %v591_v38 = vsel %vm174_vm0, %v585_v31, %v1325_v21  ;;  %v586_v27 = vsel %vm174_vm0, %v583_v8, %v585_v31 }
 0x24d   :  { %626 = vmatpush1.msra.mxu1 %v465_v35 }
 0x24e   :  { %825 = vmatmul.mubr.msk.f32.vlgmr.msra.gmra.mxu1 %vm181_vm8, %v447_v34  ;;  %749 = vmatprep.subr.mxu1 %v838_v2 }
 0x24f   :  { %v549_v37 = vpop.permute.xlu0 %548  ;;  %750 = vmatpush1.msra.mxu1 %v838_v2  ;;  %v567_v36 = vpop.permute.xlu1 %566  ;;  %801 = vmatprep.mubr.f32.mxu1 %v846_v7 }
 0x250   :  { %751 = vmatprep.subr.mxu1 %v591_v38  ;;  %v573_v23 = vsel %vm155_vm1, %v567_v36, %v1329_v25  ;;  %v568_v2 = vsel %vm155_vm1, %v1376_v52, %v567_v36  ;;  %v555_v7 = vsel %vm136_vm2, %v549_v37, %v1327_v17  ;;  %v550_v21 = vsel %vm136_vm2, %v547_v62, %v549_v37 }
 0x251   :  { %752 = vmatpush1.msra.mxu1 %v586_v27 }
 0x252   :  { %753 = vmatprep.subr.mxu1 %v573_v23 }
 0x253   :  { %v471_v39 = vpop.permute.xlu0 %470  ;;  %754 = vmatpush1.msra.mxu1 %v568_v2  ;;  %v531_v4 = vpop.permute.xlu1 %530 }
 0x254   :  { %755 = vmatprep.subr.mxu1 %v555_v7  ;;  %v537_v25 = vsel %vm117_vm3, %v531_v4, %v1333_v30  ;;  %v532_v40 = vsel %vm117_vm3, %v1378_v54, %v531_v4  ;;  %v481_v43 = vsel %vm60_vm6, %v1374_v49, %v471_v39  ;;  %v514_v30 = vsel %vm98_vm4, %v1382_v57, %v1393_v61 }
 0x255   :  { %756 = vmatpush1.msra.mxu1 %v550_v21 }
 0x256   :  { %757 = vmatprep.subr.mxu1 %v537_v25 }
 0x257   :  { %v475_v6 = vpop.permute.xlu0 %474  ;;  %758 = vmatpush1.msra.mxu1 %v532_v40  ;;  %v473_v42 = vpop.permute.xlu1 %472 }
 0x258   :  { %759 = vmatprep.subr.mxu1 %v1289_v11  ;;  %v480_v17 = vsel %vm60_vm6, %v471_v39, %v473_v42  ;;  %v515_v11 = vsel %vm98_vm4, %v1380_v55, %v1382_v57  ;;  %v478_v48 = vsel %vm60_vm6, %v475_v6, %v1412_v15  ;;  %v479_v49 = vsel %vm60_vm6, %v473_v42, %v475_v6 }
 0x259   :  { %694 = vmatprep.subr.mxu0 %v480_v17  ;;  %760 = vmatpush1.msra.mxu1 %v1271_v3  ;;  %v497_v3 = vsel %vm79_vm5, %v491_v24, %v493_v26 }
 0x25a   :  { %695 = vmatpush1.msra.mxu0 %v481_v43  ;;  %761 = vmatprep.subr.mxu1 %v514_v30 }
 0x25b   :  { %v455_v44 = vpop.permute.xlu0 %454  ;;  %762 = vmatpush1.msra.mxu1 %v515_v11  ;;  %v453_v45 = vpop.permute.xlu1 %452 }
 0x25c   :  { %v463_v46 = vsel %vm41_vm7, %v1368_v41, %v453_v45  ;;  %763 = vmatprep.subr.mxu1 %v496_v33  ;;  %v462_v47 = vsel %vm41_vm7, %v453_v45, %v455_v44 }
 0x25d   :  { %696 = vmatprep.subr.mxu0 %v462_v47  ;;  %764 = vmatpush1.msra.mxu1 %v497_v3 }
 0x25e   :  { %697 = vmatpush1.msra.mxu0 %v463_v46  ;;  %765 = vmatprep.subr.mxu1 %v478_v48 }
 0x25f   :  { %766 = vmatpush1.msra.mxu1 %v479_v49  ;;  %v457_v50 = vpop.permute.xlu1 %456  ;;  %826 = vmatmul.mubr.msk.f32.vlgmr.msra.gmra.mxu0 %vm181_vm8, %v447_v34 }
 0x260   :  { %v461_v41 = vsel %vm41_vm7, %v455_v44, %v457_v50  ;;  %v460_v51 = vsel %vm41_vm7, %v457_v50, %v459_v32 }
 0x261   :  { %767 = vmatprep.subr.mxu1 %v460_v51 }
 0x262   :  { %768 = vmatpush1.msra.mxu1 %v461_v41 }
 0x263   :  { %827 = vmatmul.mubr.msk.f32.vlgmr.msra.gmra.mxu1 %vm181_vm8, %v447_v34 }
 0x30e   :  { %v661_v52 = vpop.f32.mrf.mxu1 }
 0x30f   :  { %808 = vst [vmem:[%s1539_s5] sm:$0xff] %v661_v52 }
 0x310   :  { %v663_v53 = vpop.f32.mrf.mxu1 }
 0x311   :  { %809 = vst [vmem:[%s1539_s5 + $0x8] sm:$0xff] %v663_v53 }
 0x31f   :  { %v732_v54 = vpop.f32.mrf.mxu0 }
 0x320   :  { %810 = vst [vmem:[%s1539_s5 + $0x10] sm:$0xff] %v732_v54 }
 0x321   :  { %v734_v9 = vpop.f32.mrf.mxu0 }
 0x322   :  { %811 = vst [vmem:[%s1539_s5 + $0x18] sm:$0xff] %v734_v9 }
 0x323   :  { %v803_v55 = vpop.f32.mrf.mxu1 }
 0x324   :  { %812 = vst [vmem:[%s1539_s5 + $0x20] sm:$0xff] %v803_v55 }
 0x325   :  { %v805_v57 = vpop.f32.mrf.mxu1 }
 0x326   :  { %813 = vst [vmem:[%s1539_s5 + $0x28] sm:$0xff] %v805_v57 }

</bundles_post_ra>
